<compile_context>
chip_gen: v7x
topology: tpu7x:2x2x1
jax: 0.10.0
libtpu: 0.0.40
codegen_flags: <defaults>
</compile_context>

<pallas_src>
import functools

import jax
import jax.numpy as jnp
from jax.experimental import pallas as pl
from jax.experimental.pallas import tpu as pltpu


def _round_up(n, m):
    return ((n + m - 1) // m) * m


def _temporal_block_kernel(tidx_ref, x_ref, wbig_ref, bbig_ref, w2_ref, b2_ref,
                           o_ref, *, K, dilation, C_out_p):
    """One grid step: a chunk of causally-haloed segments folded into lanes."""
    t = tidx_ref[...]                  # (1, chunk) int32: per-lane time within its sequence
    x = x_ref[...]                     # (C_in_p, chunk) compute dtype

    shifts = [(K - 1 - j) * dilation for j in range(K)]

    def causal_windows(a):
        # Window j supplies a[:, t - shift_j], zero where t - shift_j < 0.
        # XLU lane rotation + one VPU select per tap (no unaligned-slice copies).
        wins = []
        for s in shifts:
            if s == 0:
                wins.append(a)
            else:
                w = pltpu.roll(a, shift=s, axis=1)
                wins.append(jnp.where(t >= s, w, jnp.zeros((), a.dtype)))
        return jnp.concatenate(wins, axis=0)

    # ---- conv1 (+ fused 1x1 downsample rows): ONE stacked MXU matmul ----
    xim = causal_windows(x)                                    # (K*C_in_p, chunk)
    y = jnp.dot(wbig_ref[...], xim, preferred_element_type=jnp.float32)
    y = y + bbig_ref[...]                                      # (2*C_out_p, chunk)
    h1 = jnp.maximum(y[:C_out_p], 0.0)                         # ReLU; dropout1 == identity
    res = y[C_out_p:].astype(x.dtype)                          # residual, narrowed while live

    # ---- conv2: ONE stacked MXU matmul ----
    h1im = causal_windows(h1.astype(x.dtype))                  # (K*C_out_p, chunk)
    h2 = jnp.dot(w2_ref[...], h1im, preferred_element_type=jnp.float32)
    h2 = jnp.maximum(h2 + b2_ref[...], 0.0)                    # ReLU; dropout2 == identity

    o_ref[...] = jnp.maximum(h2 + res.astype(jnp.float32), 0.0).astype(o_ref.dtype)


def temporal_block(x, W1, b1, W2, b2, Wds, bds, *, kernel_size, dilation,
                   padding, compute_dtype=jnp.bfloat16, out_dtype=None,
                   time_tile=512, segs_per_step=None):
    """TemporalBlock forward (inference).

    x: (B, C_in, L); W1: (C_out, C_in, K); W2: (C_out, C_out, K);
    Wds: (C_out, C_in, 1) or None (identity residual); bds: (C_out,) or None.

    Notes:
      * weight_norm is assumed already materialized (identity at module init);
        for trained checkpoints pass W = g * v / ||v||.
      * dropout is identity (inference only).
      * compute_dtype=float32 is a numerical-parity mode only; benchmark bf16.
    """
    B, C_in, L = x.shape
    C_out, _, K = W1.shape
    assert K == kernel_size
    assert padding == (K - 1) * dilation, "standard causal TCN padding expected"
    assert dilation >= 1 and K >= 1 and L >= 1

    if out_dtype is None:
        out_dtype = compute_dtype
    f32 = jnp.float32
    dt_bytes = jnp.dtype(compute_dtype).itemsize
    out_bytes = jnp.dtype(out_dtype).itemsize

    if Wds is None:                         # n_inputs == n_outputs -> identity residual
        Wds = jnp.eye(C_out, C_in, dtype=f32)[:, :, None]
        bds = jnp.zeros((C_out,), f32)

    # Channel padding: bf16 vregs pack 16 sublanes, f32 pack 8.
    c_mult = 16 if dt_bytes < 4 else 8
    C_in_p = _round_up(C_in, c_mult)
    C_out_p = _round_up(C_out, c_mult)

    # Time tiling: payload tile TL plus causal halo H >= 2*(K-1)*dilation (the
    # receptive field of the two chained convs), both 128-lane aligned.
    time_tile = max(128, _round_up(time_tile, 128))
    rf = 2 * (K - 1) * dilation
    H = _round_up(rf, 128) if rf > 0 else 0
    Lt = _round_up(L, 128)
    TL = Lt if Lt <= time_tile else time_tile
    Ltot = _round_up(L, TL)
    n_lt = Ltot // TL
    SEG = H + TL
    n_seg = B * n_lt

    # conv1 weights stacked over taps, the 1x1 downsample fused as extra output
    # rows on the shift-0 tap (whose window is exactly the unshifted x).
    W1s = jnp.zeros((C_out_p, K, C_in_p), f32).at[:C_out, :, :C_in].set(
        jnp.transpose(W1, (0, 2, 1)).astype(f32))
    Wds_s = jnp.zeros((C_out_p, K, C_in_p), f32).at[:C_out, K - 1, :C_in].set(
        Wds[:, :, 0].astype(f32))
    Wbig = jnp.concatenate([W1s, Wds_s], axis=0).reshape(
        2 * C_out_p, K * C_in_p).astype(compute_dtype)
    bbig = jnp.zeros((2 * C_out_p, 1), f32)
    bbig = bbig.at[:C_out, 0].set(b1.astype(f32))
    bbig = bbig.at[C_out_p:C_out_p + C_out, 0].set(bds.astype(f32))

    W2s = jnp.zeros((C_out_p, K, C_out_p), f32).at[:C_out, :, :C_out].set(
        jnp.transpose(W2, (0, 2, 1)).astype(f32)).reshape(
        C_out_p, K * C_out_p).astype(compute_dtype)
    b2p = jnp.zeros((C_out_p, 1), f32).at[:C_out, 0].set(b2.astype(f32))

    # Segmented, batch-folded-into-lanes layout: lane = ((b*n_lt + l)*SEG + p),
    # p < H is the causal halo (zeros for the first tile, previous x otherwise).
    xt = jnp.zeros((B, C_in_p, H + Ltot), compute_dtype)
    xt = xt.at[:, :C_in, H:H + L].set(x.astype(compute_dtype))
    segs = jnp.stack([xt[:, :, l * TL:l * TL + SEG] for l in range(n_lt)],
                     axis=1)                                   # (B, n_lt, C_in_p, SEG)
    xflat = jnp.transpose(segs, (2, 0, 1, 3)).reshape(C_in_p, n_seg * SEG)

    # Per-lane time index within its sequence (< 0 marks causal-halo lanes).
    t_pat = (jnp.arange(SEG, dtype=jnp.int32) - H)[None, :] + \
            (jnp.arange(n_lt, dtype=jnp.int32) * TL)[:, None]  # (n_lt, SEG)
    tflat = jnp.tile(t_pat.reshape(-1), (B,))                  # (n_seg*SEG,)

    # Segments per grid step: bound VMEM via a per-lane live-byte budget and
    # keep >= 2 grid steps so v7x's two TensorCores both get work.
    per_lane = (4 * C_in_p * dt_bytes                 # x block, double-buffered
                + 4 * C_out_p * out_bytes             # out block, double-buffered
                + K * (C_in_p + C_out_p) * dt_bytes   # xim + h1im
                + 6 * C_out_p * 4                     # y, h1, h2, out (f32 slabs)
                + 2 * C_out_p * dt_bytes              # res + h1 cast
                + 8)                                  # time index + slack
    if segs_per_step is None:
        budget = 16 * 2 ** 20
        cap = n_seg // 2 if n_seg >= 2 else 1
        segs_per_step = max(1, min(budget // (per_lane * SEG), cap))
    n_seg_pad = _round_up(n_seg, segs_per_step)
    chunk = segs_per_step * SEG
    n_lanes = n_seg_pad * SEG
    if n_seg_pad > n_seg:
        pad = n_lanes - n_seg * SEG
        xflat = jnp.concatenate(
            [xflat, jnp.zeros((C_in_p, pad), compute_dtype)], axis=1)
        tflat = jnp.concatenate([tflat, jnp.full((pad,), -1, jnp.int32)])
    tflat = tflat.reshape(1, n_lanes)

    weight_bytes = int(Wbig.size + W2s.size) * dt_bytes + int(bbig.size + b2p.size) * 4
    vmem_limit = int(min(56 * 2 ** 20,
                         max(32 * 2 ** 20, 2 * (per_lane * chunk + weight_bytes))))

    kernel = functools.partial(_temporal_block_kernel, K=K, dilation=dilation,
                               C_out_p=C_out_p)

    grid_spec = pltpu.PrefetchScalarGridSpec(
        num_scalar_prefetch=0,
        grid=(n_lanes // chunk,),
        in_specs=[
            pl.BlockSpec((1, chunk), lambda i: (0, i)),                 # time index
            pl.BlockSpec((C_in_p, chunk), lambda i: (0, i)),            # x (lane-folded)
            pl.BlockSpec((2 * C_out_p, K * C_in_p), lambda i: (0, 0)),  # W1 + Wds
            pl.BlockSpec((2 * C_out_p, 1), lambda i: (0, 0)),           # b1 ; bds
            pl.BlockSpec((C_out_p, K * C_out_p), lambda i: (0, 0)),     # W2
            pl.BlockSpec((C_out_p, 1), lambda i: (0, 0)),               # b2
        ],
        out_specs=pl.BlockSpec((C_out_p, chunk), lambda i: (0, i)),
    )

    out_flat = pl.pallas_call(
        kernel,
        out_shape=jax.ShapeDtypeStruct((C_out_p, n_lanes), out_dtype),
        grid_spec=grid_spec,
        compiler_params=pltpu.CompilerParams(
            dimension_semantics=("parallel",),
            vmem_limit_bytes=vmem_limit),
    )(tflat, xflat, Wbig, bbig, W2s, b2p)

    # Drop pad segments and halo lanes; restore (B, C_out, L).
    out = out_flat[:, :n_seg * SEG].reshape(C_out_p, B, n_lt, SEG)[:, :, :, H:]
    out = out.reshape(C_out_p, B, Ltot)
    return jnp.transpose(out, (1, 0, 2))[:, :C_out, :L]


def reference_forward(x, W1, b1, W2, b2, Wds, bds, *, dilation, padding):
    """Pure-JAX reference matching PyTorch Conv1d + Chomp1d semantics (f32)."""
    dn = ("NCH", "OIH", "NCH")

    def causal_conv(inp, W, b):
        y = jax.lax.conv_general_dilated(
            inp, W, window_strides=(1,), padding=[(padding, padding)],
            rhs_dilation=(dilation,), dimension_numbers=dn)
        y = y[:, :, : inp.shape[2]]                 # Chomp1d
        return y + b[None, :, None]

    h1 = jax.nn.relu(causal_conv(x, W1, b1))
    h2 = jax.nn.relu(causal_conv(h1, W2, b2))
    res = jax.lax.conv_general_dilated(
        x, Wds, window_strides=(1,), padding=[(0, 0)], dimension_numbers=dn)
    res = res + bds[None, :, None]
    return jax.nn.relu(h2 + res)


if __name__ == "__main__":
    key = jax.random.PRNGKey(0)

    # ---- Test 1: small config, n_inputs != n_outputs (downsample active) ----
    B, C_in, C_out, L = 2, 4, 8, 16
    kernel_size, dilation = 3, 2
    padding = (kernel_size - 1) * dilation          # 4 (standard TCN padding)

    kx, k1, k2, k3, kb1, kb2, kb3 = jax.random.split(key, 7)
    x = jax.random.normal(kx, (B, C_in, L), dtype=jnp.float32)
    W1 = 0.01 * jax.random.normal(k1, (C_out, C_in, kernel_size), dtype=jnp.float32)
    W2 = 0.01 * jax.random.normal(k2, (C_out, C_out, kernel_size), dtype=jnp.float32)
    Wds = 0.01 * jax.random.normal(k3, (C_out, C_in, 1), dtype=jnp.float32)
    b1 = 0.05 * jax.random.normal(kb1, (C_out,), dtype=jnp.float32)
    b2 = 0.05 * jax.random.normal(kb2, (C_out,), dtype=jnp.float32)
    bds = 0.05 * jax.random.normal(kb3, (C_out,), dtype=jnp.float32)

    ref = reference_forward(x, W1, b1, W2, b2, Wds, bds,
                            dilation=dilation, padding=padding)

    out_f32 = jax.block_until_ready(temporal_block(
        x, W1, b1, W2, b2, Wds, bds, kernel_size=kernel_size, dilation=dilation,
        padding=padding, compute_dtype=jnp.float32))
    assert out_f32.shape == (B, C_out, L)
    assert jnp.allclose(out_f32, ref, atol=1e-5, rtol=1e-5), "f32 mismatch vs reference"

    out_bf16 = jax.block_until_ready(temporal_block(
        x, W1, b1, W2, b2, Wds, bds, kernel_size=kernel_size, dilation=dilation,
        padding=padding, compute_dtype=jnp.bfloat16))
    assert out_bf16.shape == (B, C_out, L)
    assert jnp.allclose(out_bf16.astype(jnp.float32), ref, atol=1e-2, rtol=1e-2), \
        "bf16 mismatch vs reference"

    # ---- Test 2: multi-tile time axis (halo path) + identity residual ----
    B2, C2, L2, K2, d2 = 2, 8, 300, 3, 4
    pad2 = (K2 - 1) * d2
    kx2, k21, k22, k2b1, k2b2 = jax.random.split(jax.random.PRNGKey(1), 5)
    x2 = jax.random.normal(kx2, (B2, C2, L2), dtype=jnp.float32)
    W21 = 0.01 * jax.random.normal(k21, (C2, C2, K2), dtype=jnp.float32)
    W22 = 0.01 * jax.random.normal(k22, (C2, C2, K2), dtype=jnp.float32)
    b21 = 0.05 * jax.random.normal(k2b1, (C2,), dtype=jnp.float32)
    b22 = 0.05 * jax.random.normal(k2b2, (C2,), dtype=jnp.float32)
    Wds2 = jnp.eye(C2, dtype=jnp.float32)[:, :, None]
    bds2 = jnp.zeros((C2,), jnp.float32)

    ref2 = reference_forward(x2, W21, b21, W22, b22, Wds2, bds2,
                             dilation=d2, padding=pad2)
    out2 = jax.block_until_ready(temporal_block(
        x2, W21, b21, W22, b22, None, None, kernel_size=K2, dilation=d2,
        padding=pad2, compute_dtype=jnp.float32, time_tile=128))
    assert out2.shape == (B2, C2, L2)
    assert jnp.allclose(out2, ref2, atol=1e-5, rtol=1e-5), "L-tiled f32 mismatch"

    print("KERNEL_OK")
</pallas_src>

<mosaic_0001>
module attributes {stable_mosaic.version = 11 : i64} {
  func.func @_temporal_block_kernel(%arg0: i32, %arg1: memref<1x256xi32, #tpu.memory_space<vmem>>, %arg2: memref<8x256xf32, #tpu.memory_space<vmem>>, %arg3: memref<16x24xf32, #tpu.memory_space<vmem>>, %arg4: memref<16x1xf32, #tpu.memory_space<vmem>>, %arg5: memref<8x24xf32, #tpu.memory_space<vmem>>, %arg6: memref<8x1xf32, #tpu.memory_space<vmem>>, %arg7: memref<8x256xf32, #tpu.memory_space<vmem>>) attributes {dimension_semantics = [#tpu.dimension_semantics<parallel>], iteration_bounds = array<i64: 2>, scalar_prefetch = 0 : i64, scratch_operands = 0 : i64, tpu.core_type = #tpu.core_type<tc>, window_params = [{transform_indices = @transform_0, window_bounds = array<i64: 1, 256>}, {transform_indices = @transform_1, window_bounds = array<i64: 8, 256>}, {pipeline_mode = #tpu.pipeline_mode<synchronous>, transform_indices = @transform_2, window_bounds = array<i64: 16, 24>}, {pipeline_mode = #tpu.pipeline_mode<synchronous>, transform_indices = @transform_3, window_bounds = array<i64: 16, 1>}, {pipeline_mode = #tpu.pipeline_mode<synchronous>, transform_indices = @transform_4, window_bounds = array<i64: 8, 24>}, {pipeline_mode = #tpu.pipeline_mode<synchronous>, transform_indices = @transform_5, window_bounds = array<i64: 8, 1>}, {transform_indices = @transform_6, window_bounds = array<i64: 8, 256>}]} {
    %c0 = arith.constant 0 : index
    %c0_0 = arith.constant 0 : index
    %0 = vector.load %arg1[%c0, %c0_0] : memref<1x256xi32, #tpu.memory_space<vmem>>, vector<1x256xi32>
    %c0_1 = arith.constant 0 : index
    %c0_2 = arith.constant 0 : index
    %1 = vector.load %arg2[%c0_1, %c0_2] : memref<8x256xf32, #tpu.memory_space<vmem>>, vector<8x256xf32>
    %c4_i32 = arith.constant 4 : i32
    %2 = tpu.dynamic_rotate %1 by %c4_i32 dim 1 : vector<8x256xf32>, i32 -> vector<8x256xf32>
    %c4_i32_3 = arith.constant 4 : i32
    %3 = vector.broadcast %c4_i32_3 : i32 to vector<1x256xi32>
    %4 = arith.cmpi sge, %0, %3 : vector<1x256xi32>
    %cst = arith.constant 0.000000e+00 : f32
    %5 = vector.shape_cast %4 : vector<1x256xi1> to vector<1x256xi1>
    %6 = vector.broadcast %5 : vector<1x256xi1> to vector<8x256xi1>
    %7 = vector.broadcast %cst : f32 to vector<8x256xf32>
    %8 = arith.select %6, %2, %7 : vector<8x256xi1>, vector<8x256xf32>
    %c2_i32 = arith.constant 2 : i32
    %9 = tpu.dynamic_rotate %1 by %c2_i32 dim 1 : vector<8x256xf32>, i32 -> vector<8x256xf32>
    %c2_i32_4 = arith.constant 2 : i32
    %10 = vector.broadcast %c2_i32_4 : i32 to vector<1x256xi32>
    %11 = arith.cmpi sge, %0, %10 : vector<1x256xi32>
    %cst_5 = arith.constant 0.000000e+00 : f32
    %12 = vector.shape_cast %11 : vector<1x256xi1> to vector<1x256xi1>
    %13 = vector.broadcast %12 : vector<1x256xi1> to vector<8x256xi1>
    %14 = vector.broadcast %cst_5 : f32 to vector<8x256xf32>
    %15 = arith.select %13, %9, %14 : vector<8x256xi1>, vector<8x256xf32>
    %16 = tpu.concatenate %8, %15, %1 in 0 : vector<8x256xf32>, vector<8x256xf32>, vector<8x256xf32> -> vector<24x256xf32>
    %c0_6 = arith.constant 0 : index
    %c0_7 = arith.constant 0 : index
    %17 = vector.load %arg3[%c0_6, %c0_7] : memref<16x24xf32, #tpu.memory_space<vmem>>, vector<16x24xf32>
    %cst_8 = arith.constant dense<0.000000e+00> : vector<16x256xf32>
    %18 = tpu.matmul %17, %16, %cst_8 {dimension_numbers = #tpu.dot_dimension_numbers<[1], [0], [0], [1], [0, 0, 1, 1], [], []>} : vector<16x24xf32>, vector<24x256xf32>, vector<16x256xf32> -> vector<16x256xf32>
    %c0_9 = arith.constant 0 : index
    %c0_10 = arith.constant 0 : index
    %19 = vector.load %arg4[%c0_9, %c0_10] : memref<16x1xf32, #tpu.memory_space<vmem>>, vector<16x1xf32>
    %20 = vector.broadcast %19 : vector<16x1xf32> to vector<16x256xf32>
    %21 = arith.addf %18, %20 : vector<16x256xf32>
    %22 = vector.extract_strided_slice %21 {offsets = [0, 0], sizes = [8, 256], strides = [1, 1]} : vector<16x256xf32> to vector<8x256xf32>
    %cst_11 = arith.constant 0.000000e+00 : f32
    %23 = vector.broadcast %cst_11 : f32 to vector<8x256xf32>
    %24 = arith.maximumf %22, %23 : vector<8x256xf32>
    %25 = vector.extract_strided_slice %21 {offsets = [8, 0], sizes = [8, 256], strides = [1, 1]} : vector<16x256xf32> to vector<8x256xf32>
    %c4_i32_12 = arith.constant 4 : i32
    %26 = tpu.dynamic_rotate %24 by %c4_i32_12 dim 1 : vector<8x256xf32>, i32 -> vector<8x256xf32>
    %c4_i32_13 = arith.constant 4 : i32
    %27 = vector.broadcast %c4_i32_13 : i32 to vector<1x256xi32>
    %28 = arith.cmpi sge, %0, %27 : vector<1x256xi32>
    %cst_14 = arith.constant 0.000000e+00 : f32
    %29 = vector.shape_cast %28 : vector<1x256xi1> to vector<1x256xi1>
    %30 = vector.broadcast %29 : vector<1x256xi1> to vector<8x256xi1>
    %31 = vector.broadcast %cst_14 : f32 to vector<8x256xf32>
    %32 = arith.select %30, %26, %31 : vector<8x256xi1>, vector<8x256xf32>
    %c2_i32_15 = arith.constant 2 : i32
    %33 = tpu.dynamic_rotate %24 by %c2_i32_15 dim 1 : vector<8x256xf32>, i32 -> vector<8x256xf32>
    %c2_i32_16 = arith.constant 2 : i32
    %34 = vector.broadcast %c2_i32_16 : i32 to vector<1x256xi32>
    %35 = arith.cmpi sge, %0, %34 : vector<1x256xi32>
    %cst_17 = arith.constant 0.000000e+00 : f32
    %36 = vector.shape_cast %35 : vector<1x256xi1> to vector<1x256xi1>
    %37 = vector.broadcast %36 : vector<1x256xi1> to vector<8x256xi1>
    %38 = vector.broadcast %cst_17 : f32 to vector<8x256xf32>
    %39 = arith.select %37, %33, %38 : vector<8x256xi1>, vector<8x256xf32>
    %40 = tpu.concatenate %32, %39, %24 in 0 : vector<8x256xf32>, vector<8x256xf32>, vector<8x256xf32> -> vector<24x256xf32>
    %c0_18 = arith.constant 0 : index
    %c0_19 = arith.constant 0 : index
    %41 = vector.load %arg5[%c0_18, %c0_19] : memref<8x24xf32, #tpu.memory_space<vmem>>, vector<8x24xf32>
    %cst_20 = arith.constant dense<0.000000e+00> : vector<8x256xf32>
    %42 = tpu.matmul %41, %40, %cst_20 {dimension_numbers = #tpu.dot_dimension_numbers<[1], [0], [0], [1], [0, 0, 1, 1], [], []>} : vector<8x24xf32>, vector<24x256xf32>, vector<8x256xf32> -> vector<8x256xf32>
    %c0_21 = arith.constant 0 : index
    %c0_22 = arith.constant 0 : index
    %43 = vector.load %arg6[%c0_21, %c0_22] : memref<8x1xf32, #tpu.memory_space<vmem>>, vector<8x1xf32>
    %44 = vector.broadcast %43 : vector<8x1xf32> to vector<8x256xf32>
    %45 = arith.addf %42, %44 : vector<8x256xf32>
    %cst_23 = arith.constant 0.000000e+00 : f32
    %46 = vector.broadcast %cst_23 : f32 to vector<8x256xf32>
    %47 = arith.maximumf %45, %46 : vector<8x256xf32>
    %48 = arith.addf %47, %25 : vector<8x256xf32>
    %cst_24 = arith.constant 0.000000e+00 : f32
    %49 = vector.broadcast %cst_24 : f32 to vector<8x256xf32>
    %50 = arith.maximumf %48, %49 : vector<8x256xf32>
    %c0_25 = arith.constant 0 : index
    %c0_26 = arith.constant 0 : index
    %51 = vector.load %arg7[%c0_25, %c0_26] : memref<8x256xf32, #tpu.memory_space<vmem>>, vector<8x256xf32>
    tpu.vector_store %arg7[%c0_25, %c0_26], %50 {strides = array<i32>} : memref<8x256xf32, #tpu.memory_space<vmem>>, vector<8x256xf32>,
    return
  }
  func.func @transform_0(%arg0: i32) -> (i32, i32) {
    %c0_i32 = arith.constant 0 : i32
    %c0_i32_0 = arith.constant 0 : i32
    return %c0_i32, %arg0 : i32, i32
  }
  func.func @transform_1(%arg0: i32) -> (i32, i32) {
    %c0_i32 = arith.constant 0 : i32
    %c0_i32_0 = arith.constant 0 : i32
    return %c0_i32, %arg0 : i32, i32
  }
  func.func @transform_2(%arg0: i32) -> (i32, i32) {
    %c0_i32 = arith.constant 0 : i32
    %c0_i32_0 = arith.constant 0 : i32
    %c0_i32_1 = arith.constant 0 : i32
    return %c0_i32, %c0_i32_0 : i32, i32
  }
  func.func @transform_3(%arg0: i32) -> (i32, i32) {
    %c0_i32 = arith.constant 0 : i32
    %c0_i32_0 = arith.constant 0 : i32
    %c0_i32_1 = arith.constant 0 : i32
    return %c0_i32, %c0_i32_0 : i32, i32
  }
  func.func @transform_4(%arg0: i32) -> (i32, i32) {
    %c0_i32 = arith.constant 0 : i32
    %c0_i32_0 = arith.constant 0 : i32
    %c0_i32_1 = arith.constant 0 : i32
    return %c0_i32, %c0_i32_0 : i32, i32
  }
  func.func @transform_5(%arg0: i32) -> (i32, i32) {
    %c0_i32 = arith.constant 0 : i32
    %c0_i32_0 = arith.constant 0 : i32
    %c0_i32_1 = arith.constant 0 : i32
    return %c0_i32, %c0_i32_0 : i32, i32
  }
  func.func @transform_6(%arg0: i32) -> (i32, i32) {
    %c0_i32 = arith.constant 0 : i32
    %c0_i32_0 = arith.constant 0 : i32
    return %c0_i32, %arg0 : i32, i32
  }
}

</mosaic_0001>

<bundles_post_ra>
// kernel: tpu_custom_call.1
= control target key start
LH: loop header
LB: loop body
LE: loop exit
PB: predicated region body
PF: predicated region fallthrough
CT: control target
= control target key end

     0   :  { %11 = vsyncpa [#allocation3], 0  ;;  %s1104_s0 = inlined_call_operand.vmem [shape: s32[1,512], index: 0, kind: input, shape index: {}]   ;;  %s1105_s1 = inlined_call_operand.hbm [shape: f32[8,512], index: 1, kind: input, shape index: {}]   ;;  %s1106_s2 = inlined_call_operand.vmem [shape: f32[16,24], index: 2, kind: input, shape index: {}]   ;;  %s1107_s3 = inlined_call_operand.vmem [shape: f32[16,1], index: 3, kind: input, shape index: {}]   ;;  %s1108_s4 = inlined_call_operand.vmem [shape: f32[8,24], index: 4, kind: input, shape index: {}]   ;;  %s1109_s5 = inlined_call_operand.vmem [shape: f32[8,1], index: 5, kind: input, shape index: {}]   ;;  %s1110_s6 = inlined_call_operand.hbm [shape: f32[8,512], index: 6, kind: output, shape index: {}]  }
   0x1   :  { %13 = vsyncpa [#allocation3 + $0x1], 0 }
   0x2   :  { %14 = vsyncpa [#allocation4], 0 }
   0x3   :  { %16 = vsyncpa [#allocation4 + $0x1], 0  ;;  %s886_s21 = smov 0   ;;  %s888_s22 = smov 0  }
   0x4   :  { %s890_s23 = smov 0   ;;  %s892_s24 = smov 0  }
   0x5 LB: > { %s907_s25 = sadd.s32 4294967295, %s843_s24   ;;  %s635_s26 = sadd.s32 4294967294, %s843_s24   ;;  %s843_s24 = sphi %s892_s24, %s1129_s24   ;;  %s839_s23 = sphi %s890_s23, %s1128_s23   ;;  %s835_s22 = sphi %s888_s22, %s1127_s22   ;;  %s831_s21 = sphi %s886_s21, %s1126_s21  }
   0x6   : > { %s911_s27 = sadd.s32 1, %s843_s24   ;;  %s55_s28 = sadd.s32 1, %s839_s23 }
   0x7   : > { %s52_s29 = ssub.s32 %s843_s24, %s911_s27  ;;  %p62_p0 = scmp.ne.s32.totalorder %s839_s23, %s835_s22 }
   0x8   : > { %p53_p1 = scmp.eq.s32.totalorder %s52_s29, 0  ;;  %p63_p2 = scmp.eq.s32.totalorder %s843_s24, 0 }
   0x9   : > { %p68_p3 = scmp.ne.s32.totalorder %s835_s22, %s831_s21  ;;  %p69_p4 = scmp.eq.s32.totalorder %s907_s25, 0 }
   0xa   : > { %s923_s30 = scalar_select %p53_p1, %s839_s23, %s55_s28  }
   0xb   : > { %p925_p5 = por %p63_p2, %p62_p0  ;;  %p929_p6 = por %p69_p4, %p68_p3 }
   0xc   : > { %p176_p7 = scmp.eq.s32.totalorder %s907_s25, 1  ;;  %p182_p8 = scmp.eq.s32.totalorder %s635_s26, 1 }
   0xd   : > { %p687_p10 = scmp.lt.s32.totalorder %s843_s24, 2  ;;  %s222_s11 = sand.u32 1, %s839_s23  }
   0xe   : > { %p936_p11 = por %p176_p7, %p62_p0  ;;  %p940_p12 = por %p182_p8, %p68_p3 }
   0xf   : > { %s661_s12 = sshll.u32 %s843_s24, 8  ;;  %s638_s13 = sshll.u32 %s222_s11, 4 }
  0x10   : > { %s1114_s9 = scalar_select %p936_p11, 1, 0 }
  0x11   : > { %s1115_s10 = scalar_select %p940_p12, 1, 0 }
  0x12   : > { %s949_s16 = scalar_lea.hbm %s1105_s1, %s661_s12  ;;  %s226_s17 = scalar_lea.vmem [#allocation2], %s638_s13 }
  0x13   : > { %s234_s18 = sshll.u32 %s226_s17, 4  ;;  %p953_p13 = pnand %p687_p10, %p925_p5  ;;  %s957_s18 = int_to_ptr.vmem [resolvable:$true] %s234_s18 }
  0x14   : > { %s223_s20 = scalar_lea.sflag [#allocation3], %s222_s11  ;;  %s747_s26 = scalar_lea.hbm %s949_s16, 256 }
  0x15   : > { %p748_p2 = scmp.ne.s32.totalorder %s949_s16, %s747_s26  ;;  %p749_p3 = pneg %p953_p13 }
  0x16   : > { %s752_s7 = scalar_lea.hbm %s1105_s1, 512  ;;  %p753_p5 = scmp.lt.u32.totalorder %s949_s16, %s1105_s1 }
  0x17   : > { %p750_p4 = pnand %p749_p3, %p748_p2  ;;  %p754_p8 = scmp.lt.u32.totalorder %s752_s7, %s747_s26 }
  0x18   : > { %p756_p9 = scmp.lt.u32.totalorder %s747_s26, %s949_s16 }
  0x19   : > { %p751_p7 = pneg %p750_p4  ;;  %p755_p10 = por %p754_p8, %p753_p5 }
  0x1b   : > { %p757_p0 = por %p756_p9, %p755_p10 }
  0x1d   : > { %p758_p1 = pnand %p757_p0, %p751_p7 }
  0x1f   : > { %761 = shalt.err (!%p758_p1)
}
  0x20   : > { %s762_s11 = scalar_lea.vmem %s957_s18, 256  ;;  %s845_s14 = smov [#allocation2]  }
  0x21   : > { %p763_p2 = scmp.ne.s32.totalorder %s957_s18, %s762_s11  ;;  %s767_s15 = sshll.u32 %s845_s14, 4  ;;  %s768_s15 = int_to_ptr.vmem [resolvable:$false] %s767_s15 }
  0x22   : > { %s769_s17 = scalar_lea.vmem %s768_s15, 512  ;;  %p770_p11 = scmp.lt.s32.totalorder %s957_s18, %s768_s15 }
  0x23   : > { %p765_p4 = pnand %p763_p2, %p749_p3  ;;  %p771_p5 = scmp.lt.s32.totalorder %s769_s17, %s762_s11 }
  0x25   : > { %p766_p12 = pneg %p765_p4  ;;  %p772_p8 = por %p771_p5, %p770_p11 }
  0x27   : > { %p773_p9 = pnand %p772_p8, %p766_p12 }
  0x29   : > { %776 = shalt.err (!%p773_p9)
}
  0x2a   : > { %682 = dma.hbm_to_vmem [thread:$0]  (!%p953_p13), %s949_s16, 256, %s957_s18, %s223_s20  }
  0x2b   : > { %p1117_p0 = scmp.lt.s32.totalorder %s843_s24, 3  ;;  %p1118_p1 = scmp.ge.s32.totalorder %s843_s24, 1 }
  0x2d   : > { %p240_p3 = pnand %p1118_p1, %p1117_p0 }
  0x2e   : > { %s991_s26 = sand.u32 (!%p240_p3), 1, %s835_s22  }
  0x2f   : > { %243 = sbr.rel (%p240_p3) target bundleno = 768 (0x300), region = 44  ;;  %s642_s28 = sshll.u32 (!%p240_p3), %s991_s26, 4 }
  0x30   : > { %s246_s29 = scalar_lea.sflag (!%p240_p3), [#allocation3], %s991_s26  ;;  %s249_s19 = scalar_lea.vmem (!%p240_p3), [#allocation2], %s642_s28 }
  0x36   : > { %822 = dma.done.wait (%p929_p6), %s246_s29, 256  }
  0x37   : > { %824 = vsyncadd (%p929_p6), %s246_s29, 4294967040  ;;  %v846_v0 = vmov 0   ;;  %v290_v1 = vld [vmem:[%s249_s19] sm:$0xff]  ;;  %v291_v2 = vld [vmem:[%s249_s19 + $0x8] sm:$0xff]  ;;  %s847_s16 = smov 4   ;;  %v848_v4 = vmov 0.0   ;;  %v296_v6 = vlaneseq }
  0x38   : > { %735 = vset.pattern.permute.xlu1 %v846_v0  ;;  %746 = vset.pattern.permute.xlu0 %v846_v0  ;;  %v725_v3 = vpack.i.bf16 %v291_v2, %v290_v1  ;;  %v338_v5 = vld [vmem:[%s1107_s3] sm:$0xff]  ;;  %s849_s8 = smov 2   ;;  %s644_s7 = sshll.u32 %s907_s25, 1  ;;  %vm350_vm10 = vcmask 195584   ;;  %v337_v41 = vld [vmem:[%s1106_s2 + $0x8] sm:$0xff] }
  0x39   : > { %421 = vmatprep.mubr.f32.mxu0 %v848_v4  ;;  %526 = vmatprep.mubr.f32.mxu1 %v848_v4  ;;  %p283_p6 = scmp.lt.s32.totalorder %s644_s7, 3  ;;  %v304_v8 = vshrl.u32 %v296_v6, 7  ;;  %v297_v14 = vand.u32 127, %v296_v6  ;;  %v336_v32 = vld [vmem:[%s1106_s2] sm:$0xff]  ;;  %v339_v43 = vld [vmem:[%s1107_s3 + $0x8] sm:$0xff]  ;;  %s662_s12 = sshll.u32 %s907_s25, 8 }
  0x3a   : > { %726 = vrot.lane.b32.xlu0 %v725_v3, %s847_s16  ;;  %342 = vperm.xlu1 %735, %v338_v5   ;;  %v453_v42 = vld [vmem:[%s1109_s5] sm:$0xff]  ;;  %s281_s13 = scalar_lea.vmem [#allocation5], %s642_s28  ;;  %s1060_s17 = scalar_lea.hbm %s1110_s6, %s662_s12 }
  0x3b   : > { %s1131_s7 = smov (!%p283_p6, %s644_s7), 3  ;;  %v309_v9 = vsub.s32 1, %v304_v8  ;;  %v305_v12 = vsub.s32 0, %v304_v8  ;;  %vm298_vm2 = vcmp.lt.s32.totalorder %v297_v14, 4  ;;  %vm319_vm4 = vcmp.lt.s32.totalorder %v297_v14, 2  ;;  %v452_v56 = vld [vmem:[%s1108_s4] sm:$0xff] }
  0x3c   : > { %s285_s11 = scalar_lea.vmem %s1104_s0, %s1131_s7  ;;  %s542_s29 = scalar_lea.sflag [#allocation4], %s991_s26 }
  0x3d   : > { %v289_v7 = vld [vmem:[%s285_s11] sm:$0x3]  ;;  %s556_s11 = sshll.u32 %s281_s13, 4  ;;  %p1123_p12 = scmp.ne.s32.totalorder %s1114_s9, 0  ;;  %s1062_s11 = int_to_ptr.vmem [resolvable:$true] %s556_s11 }
  0x3e   : > { %731 = vrot.lane.b32.xlu0 %v725_v3, %s849_s8  ;;  %vm301_vm0 = vcmp.ge.s32.totalorder %v289_v7, 4  ;;  %vm322_vm1 = vcmp.ge.s32.totalorder %v289_v7, 2  ;;  %s777_s25 = scalar_lea.vmem %s1062_s11, 256  ;;  %s850_s28 = smov [#allocation5]  }
  0x3f   : > { %v302_v10 = vsel %vm301_vm0, 1, %v846_v0  ;;  %v323_v11 = vsel %vm322_vm1, 1, %v846_v0  ;;  %p778_p11 = scmp.ne.s32.totalorder %s1062_s11, %s777_s25  ;;  %s781_s19 = sshll.u32 %s850_s28, 4  ;;  %s782_s19 = int_to_ptr.vmem [resolvable:$false] %s781_s19 }
  0x40   : > { %v310_v15 = vrot.slane %v302_v10, %v309_v9  ;;  %v331_v16 = vrot.slane %v323_v11, %v309_v9  ;;  %v306_v17 = vrot.slane %v302_v10, %v305_v12  ;;  %v327_v18 = vrot.slane %v323_v11, %v305_v12  ;;  %s783_s18 = scalar_lea.vmem %s782_s19, 512  ;;  %p784_p10 = scmp.lt.s32.totalorder %s1062_s11, %s782_s19 }
  0x41   : > { %p779_p13 = pnand %p778_p11, %p1123_p12  ;;  %p785_p2 = scmp.lt.s32.totalorder %s783_s18, %s777_s25 }
  0x42   : > { %vm312_vm3 = vcmp.eq.s32.totalorder %v310_v15, 1  ;;  %vm333_vm5 = vcmp.eq.s32.totalorder %v331_v16, 1  ;;  %vm311_vm6 = vcmp.eq.s32.totalorder %v306_v17, 1  ;;  %vm332_vm7 = vcmp.eq.s32.totalorder %v327_v18, 1 }
  0x43   : > { %vm1012_vm8 = vmpackc.low %vm333_vm5, %vm312_vm3  ;;  %p780_p7 = pneg %p779_p13  ;;  %p786_p4 = por %p785_p2, %p784_p10 }
  0x44   : > { %vm1018_vm9 = vmpackc.low %vm332_vm7, %vm311_vm6 }
  0x45   : > { %p787_p5 = pnand %p786_p4, %p780_p7 }
  0xac   : > { %v727_v13 = vpop.permute.xlu0 %726 }
  0xad   : > { %v729_v19 = vunpack.i.h.bf16 %v727_v13  ;;  %v728_v20 = vunpack.i.l.bf16 %v727_v13 }
  0xaf   : > { %v299_v24 = vsel %vm298_vm2, %v728_v20, %v729_v19  ;;  %v300_v27 = vsel %vm298_vm2, %v729_v19, %v728_v20 }
  0xb0   : > { %v732_v21 = vpop.permute.xlu0 %731 }
  0xb1   : > { %v734_v22 = vunpack.i.h.bf16 %v732_v21  ;;  %v733_v23 = vunpack.i.l.bf16 %v732_v21 }
  0xb3   : > { %v320_v25 = vsel %vm319_vm4, %v733_v23, %v734_v22  ;;  %v321_v28 = vsel %vm319_vm4, %v734_v22, %v733_v23 }
  0xb4   : > { %v663_v29 = vpack.c.bf16 %v320_v25, %v299_v24  ;;  %v666_v30 = vpack.c.bf16 %v321_v28, %v300_v27 }
  0xb6   : > { %665 = vmatprep.subr.msk.bf16.mxu0 %vm1012_vm8, %v663_v29 }
  0xb7   : > { %668 = vmatpush1.bf16.msk.msra.mxu0 %vm1018_vm9, %v666_v30 }
  0xb8   : > { %361 = vmatprep.subr.mxu0 %v291_v2 }
  0xb9   : > { %v343_v33 = vpop.permute.xlu1 %342 }
  0xbb   : > { %362 = vmatpush1.msra.mxu0 %v290_v1 }
  0xbc   : > { %649 = vmatmul.mubr.msk.f32.vlgmr.msra.gmra.mrb[0].mxu0 %vm350_vm10, %v336_v32 }
  0xbd   : > { %427 = vmatprep.mubr.f32.mxu0 %v848_v4 }
  0xc0   : > { %650 = vmatmul.mubr.msk.f32.gmra.mrb[2].mxu0 %vm350_vm10, %v337_v41 }
 0x18f   : > { %v423_v34 = vpop.f32.mrb[0].mxu0 }
 0x190   : > { %v424_v35 = vadd.f32 %v423_v34, %v343_v33  ;;  %v425_v36 = vpop.f32.mrb[1].mxu0 }
 0x191   : > { %v426_v37 = vadd.f32 %v425_v36, %v343_v33 }
 0x192   : > { %v434_v38 = vmax.f32 %v424_v35, 0.0 }
 0x193   : > { %v435_v39 = vmax.f32 %v426_v37, 0.0  ;;  %v429_v57 = vpop.f32.mrb[2].mxu0 }
 0x194   : > { %v431_v58 = vpop.f32.mrb[3].mxu0 }
 0x195   : > { %v741_v40 = vpack.i.bf16 %v435_v39, %v434_v38 }
 0x197   : > { %742 = vrot.lane.b32.xlu0 %v741_v40, %s849_s8  ;;  %737 = vrot.lane.b32.xlu1 %v741_v40, %s847_s16 }
 0x19b   : > { %456 = vperm.xlu1 %735, %v453_v42   ;;  %347 = vperm.xlu0 %746, %v339_v43  }
 0x209   : > { %v743_v44 = vpop.permute.xlu0 %742  ;;  %v738_v45 = vpop.permute.xlu1 %737 }
 0x20a   : > { %v745_v46 = vunpack.i.h.bf16 %v743_v44  ;;  %v744_v47 = vunpack.i.l.bf16 %v743_v44  ;;  %v740_v48 = vunpack.i.h.bf16 %v738_v45  ;;  %v739_v49 = vunpack.i.l.bf16 %v738_v45 }
 0x20c   : > { %v440_v50 = vsel %vm298_vm2, %v739_v49, %v740_v48  ;;  %v448_v51 = vsel %vm319_vm4, %v744_v47, %v745_v46  ;;  %v441_v52 = vsel %vm298_vm2, %v740_v48, %v739_v49  ;;  %v449_v53 = vsel %vm319_vm4, %v745_v46, %v744_v47 }
 0x20d   : > { %v669_v54 = vpack.c.bf16 %v448_v51, %v440_v50  ;;  %v672_v55 = vpack.c.bf16 %v449_v53, %v441_v52 }
 0x20f   : > { %671 = vmatprep.subr.msk.bf16.mxu1 %vm1012_vm8, %v669_v54 }
 0x210   : > { %674 = vmatpush1.bf16.msk.msra.mxu1 %vm1018_vm9, %v672_v55 }
 0x211   : > { %466 = vmatprep.subr.mxu1 %v435_v39 }
 0x214   : > { %467 = vmatpush1.msra.mxu1 %v434_v38 }
 0x215   : > { %655 = vmatmul.mubr.msk.f32.vlgmr.msra.gmra.mrb[0].mxu1 %vm350_vm10, %v452_v56 }
 0x21a   : > { %v348_v59 = vpop.permute.xlu0 %347  ;;  %v457_v60 = vpop.permute.xlu1 %456 }
 0x21b   : > { %v430_v0 = vadd.f32 %v429_v57, %v348_v59  ;;  %v432_v2 = vadd.f32 %v431_v58, %v348_v59 }
 0x2e8   : > { %v528_v61 = vpop.f32.mrb[0].mxu1 }
 0x2e9   : > { %v529_v62 = vadd.f32 %v528_v61, %v457_v60  ;;  %v530_v63 = vpop.f32.mrb[1].mxu1 }
 0x2ea   : > { %v531_v1 = vadd.f32 %v530_v63, %v457_v60 }
 0x2eb   : > { %v533_v3 = vmax.f32 %v529_v62, 0.0 }
 0x2ec   : > { %v534_v4 = vmax.f32 %v531_v1, 0.0 }
 0x2ed   : > { %v535_v5 = vadd.f32 %v533_v3, %v430_v0 }
 0x2ee   : > { %v536_v6 = vadd.f32 %v534_v4, %v432_v2 }
 0x2ef   : > { %v537_v7 = vmax.f32 %v535_v5, 0.0 }
 0x2f0   : > { %v538_v8 = vmax.f32 %v536_v6, 0.0 }
 0x2f1   : > { %539 = vst [vmem:[%s281_s13] sm:$0xff] %v537_v7 }
 0x2f2   : > { %540 = vst [vmem:[%s281_s13 + $0x8] sm:$0xff] %v538_v8 }
 0x2f3   : > { %790 = shalt.err (!%p787_p5)
}
 0x2f4   : > { %s791_s26 = scalar_lea.hbm %s1060_s17, 256  ;;  %s795_s16 = scalar_lea.hbm %s1110_s6, 512 }
 0x2f5   : > { %p792_p8 = scmp.ne.s32.totalorder %s1060_s17, %s791_s26  ;;  %p796_p1 = scmp.lt.u32.totalorder %s1060_s17, %s1110_s6 }
 0x2f6   : > { %p797_p3 = scmp.lt.u32.totalorder %s795_s16, %s791_s26  ;;  %p799_p11 = scmp.lt.u32.totalorder %s791_s26, %s1060_s17 }
 0x2f7   : > { %p793_p9 = pnand %p792_p8, %p1123_p12 }
 0x2f8   : > { %p798_p6 = por %p797_p3, %p796_p1 }
 0x2f9   : > { %p794_p0 = pneg %p793_p9 }
 0x2fa   : > { %p800_p13 = por %p799_p11, %p798_p6 }
 0x2fc   : > { %p801_p7 = pnand %p800_p13, %p794_p0 }
 0x2fe   : > { %804 = shalt.err (!%p801_p7)
}
 0x2ff   : > { %677 = dma.vmem_to_hbm [thread:$0]  (%p1123_p12), %s1062_s11, 256, %s1060_s17, %s542_s29  }
 0x300 PF: > { %s568_s13 = sand.u32 1, %s831_s21   ;;  %p1124_p10 = scmp.ne.s32.totalorder %s1115_s10, 0 }
 0x301   : > { %p1125_p2 = scmp.ge.s32.totalorder %s843_s24, 2  ;;  %s569_s14 = scalar_lea.sflag [#allocation4], %s568_s13 }
 0x303   : > { %p684_p4 = pnand %p1125_p2, %p1124_p10 }
 0x305   : > { %826 = dma.done.wait (!%p684_p4), %s569_s14, 256  }
 0x306   : > { %828 = vsyncadd (!%p684_p4), %s569_s14, 4294967040  ;;  %p19_p5 = scmp.ge.s32.totalorder %s911_s27, 4   ;;  %s1126_s21 = smov %s835_s22 }
 0x307   : > { %s1127_s22 = smov %s839_s23  ;;  %s1128_s23 = smov %s923_s30 }
 0x308   : > { %s1129_s24 = smov %s911_s27  ;;  %21 = sbr.rel (!%p19_p5) target bundleno = 5 (0x5), region = 92 }
 0x30f   :  { %574 = vsyncpa [#allocation3], 1 }
 0x310   :  { %576 = vsyncpa [#allocation3 + $0x1], 1 }
 0x311   :  { %577 = vsyncpa [#allocation4], 1 }
 0x312   :  { %579 = vsyncpa [#allocation4 + $0x1], 1 }

</bundles_post_ra>
